<compile_context>
chip_gen: v7x
topology: tpu7x:2x2x1
jax: 0.10.0
libtpu: 0.0.40
codegen_flags: <defaults>
</compile_context>

<pallas_src>
import jax
import jax.numpy as jnp
from jax.experimental import pallas as pl
from jax.experimental.pallas import tpu as pltpu


def _round_up(x, m):
    return (x + m - 1) // m * m


def _lora_linear_kernel(x_ref, wt_ref, z_ref, bts_ref, b_ref, o_ref, acc_ref):
    """One (tm, tn) output tile, accumulated over the K grid axis (innermost)."""
    k = pl.program_id(2)

    @pl.when(k == 0)
    def _init():
        # Seed the f32 accumulator with the rank-r LoRA contribution.
        # z = dropout(x) @ A^T was hoisted outside the kernel; bts = B^T * alpha/r (f32).
        acc_ref[...] = jnp.dot(z_ref[...], bts_ref[...],
                               preferred_element_type=jnp.float32)

    # Frozen pretrained path, one K panel per step (MXU, f32 accumulation).
    acc_ref[...] += jnp.dot(x_ref[...], wt_ref[...],
                            preferred_element_type=jnp.float32)

    @pl.when(k == pl.num_programs(2) - 1)
    def _finalize():
        # Bias added once per output tile, in f32, before the final cast.
        o_ref[...] = (acc_ref[...] + b_ref[...]).astype(o_ref.dtype)


def prepare_lora_params(weight, bias, lora_A, lora_B, *, lora_alpha, r):
    """Call-once parameter prep: pre-transpose, fold alpha/r into B^T (kept in f32).

    weight: (N, K)  bias: (N,)  lora_A: (r, K)  lora_B: (N, r)
    Returns wt:(K,N), bias_f32:(N,), at:(K,r), bts_f32:(r,N) with scaling folded in.
    """
    scaling = jnp.float32(lora_alpha) / jnp.float32(r)
    return (weight.T, bias.astype(jnp.float32), lora_A.T,
            (lora_B.T.astype(jnp.float32) * scaling))


def _pick_tiles(M, N, K, r, x_itemsize, out_itemsize, tm, tn, budget):
    """Choose (tm, tn, tk) so the double-buffered working set fits the VMEM budget."""
    pack = {4: 8, 2: 16, 1: 32}.get(x_itemsize, 8)          # sublane pack per dtype
    tm = max(pack, _round_up(min(tm, _round_up(M, pack)), pack))
    tn = max(128, _round_up(min(tn, _round_up(N, 128)), 128))
    tk = K if K <= 128 else _round_up(K, 128)               # start full-K resident

    def footprint(tm_, tn_, tk_):
        stream = (tm_ * tk_ + tk_ * tn_) * x_itemsize        # x tile + W^T panel
        lora = (tm_ * r + r * tn_ + tn_) * 4                 # z, bts, bias (f32)
        out = tm_ * tn_ * out_itemsize
        acc = tm_ * tn_ * 4                                  # f32 accumulator scratch
        return 2 * (stream + lora + out) + acc               # double-buffered IO + scratch

    # Shrink the K panel first (keeps output-tile arithmetic intensity), then tn, then tm.
    while footprint(tm, tn, tk) > budget and tk > 512:
        tk = max(512, _round_up(tk // 2, 128))
    while footprint(tm, tn, tk) > budget and tn > 256:
        tn = max(256, _round_up(tn // 2, 128))
    while footprint(tm, tn, tk) > budget and tm > pack:
        tm = max(pack, _round_up(tm // 2, pack))
    if tk >= K:
        tk = K                                               # full-K resident, no K pad
    return tm, tn, tk, footprint(tm, tn, tk)


def lora_linear_forward(x, wt, bias, at, bts, *, tm=256, tn=1024,
                        compute_dtype=jnp.bfloat16):
    """Fused LoRA linear forward.

    x: (..., K); wt: (K, N) = W^T; bias: (N,) f32; at: (K, r) = A^T;
    bts: (r, N) = B^T * alpha/r, kept in f32 for precision.
    compute_dtype: dtype for x / W^T / A^T on the MXU (bf16 default on all
    generations); accumulation is f32 and the output keeps x's original dtype.
    """
    orig_shape = x.shape
    K = orig_shape[-1]
    out_dtype = x.dtype
    x2 = x.reshape(-1, K)
    M = x2.shape[0]
    N = wt.shape[1]
    r = at.shape[1]

    if compute_dtype is not None:
        x2 = x2.astype(compute_dtype)
        wt = wt.astype(compute_dtype)
        at = at.astype(compute_dtype)
    bias = bias.astype(jnp.float32)
    bts = bts.astype(jnp.float32)

    # ---- VMEM budget (per TensorCore): ~75% of physical, leaving compiler headroom.
    try:
        vmem_cap = int(pltpu.get_tpu_info().vmem_capacity_bytes)
    except Exception:
        vmem_cap = 64 << 20                                   # conservative (v7x size)
    budget = (vmem_cap * 3) // 4

    x_item = jnp.dtype(x2.dtype).itemsize
    out_item = jnp.dtype(out_dtype).itemsize
    tm, tn, tk, footprint = _pick_tiles(M, N, K, r, x_item, out_item, tm, tn, budget)

    Mp = _round_up(M, tm)
    Np = _round_up(N, tn)
    Kp = _round_up(K, tk)

    if Mp != M or Kp != K:
        x2 = jnp.pad(x2, ((0, Mp - M), (0, Kp - K)))
    if Kp != K or Np != N:
        wt = jnp.pad(wt, ((0, Kp - K), (0, Np - N)))
    if Kp != K:
        at = jnp.pad(at, ((0, Kp - K), (0, 0)))
    if Np != N:
        bts = jnp.pad(bts, ((0, 0), (0, Np - N)))
        bias = jnp.pad(bias, (0, Np - N))
    b2 = bias.reshape(1, Np)

    # Rank-r projection hoisted out of the per-(i, j) tile loop: it depends only on
    # the token tile, not on the output-feature tile.  Kept in f32 (tiny: Mp x r).
    # TODO(synk): lora_dropout > 0 (training-mode dropout on x) not implemented; p=0 is identity.
    z = jnp.dot(x2, at, preferred_element_type=jnp.float32)   # (Mp, r)

    nj, ni, nk = Np // tn, Mp // tm, Kp // tk
    grid = (nj, ni, nk)

    vmem_limit = int(min(budget, max(footprint + footprint // 4, 4 << 20)))

    # Advisory cost: x (and z) are re-streamed once per N block; W^T is read once
    # when the full K panel is resident, once per token tile otherwise.
    flops = 2 * Mp * Np * Kp + 2 * Mp * r * Np
    bytes_accessed = (nj * Mp * Kp * x_item
                      + (1 if nk == 1 else ni) * Kp * Np * x_item
                      + nj * Mp * r * 4
                      + r * Np * 4 + Np * 4
                      + Mp * Np * out_item)

    out = pl.pallas_call(
        _lora_linear_kernel,
        out_shape=jax.ShapeDtypeStruct((Mp, Np), out_dtype),
        grid_spec=pltpu.PrefetchScalarGridSpec(
            num_scalar_prefetch=0,
            grid=grid,
            in_specs=[
                pl.BlockSpec((tm, tk), lambda j, i, k: (i, k)),   # x tile (streams)
                pl.BlockSpec((tk, tn), lambda j, i, k: (k, j)),   # W^T panel (resident over i when nk==1)
                pl.BlockSpec((tm, r), lambda j, i, k: (i, 0)),    # z = x @ A^T (hoisted, f32)
                pl.BlockSpec((r, tn), lambda j, i, k: (0, j)),    # B^T * alpha/r slice (f32)
                pl.BlockSpec((1, tn), lambda j, i, k: (0, j)),    # bias slice (f32)
            ],
            out_specs=pl.BlockSpec((tm, tn), lambda j, i, k: (i, j)),
            scratch_shapes=[pltpu.VMEM((tm, tn), jnp.float32)],   # f32 accumulator
        ),
        compiler_params=pltpu.CompilerParams(
            # N axis parallel: v7x megacore gives each TensorCore a disjoint set of
            # W^T panels (read-weights-once preserved); K carries the accumulator.
            dimension_semantics=("parallel", "arbitrary", "arbitrary"),
            vmem_limit_bytes=vmem_limit,
        ),
        cost_estimate=pl.CostEstimate(flops=int(flops), transcendentals=0,
                                      bytes_accessed=int(bytes_accessed)),
    )(x2, wt, z, bts, b2)

    out = out[:M, :N]
    return out.reshape(orig_shape[:-1] + (N,))


if __name__ == "__main__":
    # Small shapes: batch=2, seq=8 -> 16 tokens; in_features=32, out_features=64, r=4.
    batch, seq = 2, 8
    in_features, out_features = 32, 64
    r, lora_alpha = 4, 8

    key = jax.random.PRNGKey(0)
    kx, kw, kb, ka, kB = jax.random.split(key, 5)

    x = jax.random.normal(kx, (batch, seq, in_features), dtype=jnp.float32)

    # Deterministic parameter init matching the module's shapes.
    # nn.Linear default: U(-1/sqrt(K), 1/sqrt(K)); lora_A: kaiming_uniform(a=sqrt(5)).
    # lora_B is zeros in the module's reset_parameters; small nonzero values are used
    # here so the LoRA branch contributes non-trivially (synthetic weights).
    lim = 1.0 / (in_features ** 0.5)
    weight = jax.random.uniform(kw, (out_features, in_features),
                                minval=-lim, maxval=lim, dtype=jnp.float32)
    bias = jax.random.uniform(kb, (out_features,),
                              minval=-lim, maxval=lim, dtype=jnp.float32)
    lora_A = jax.random.uniform(ka, (r, in_features),
                                minval=-lim, maxval=lim, dtype=jnp.float32)
    lora_B = 0.02 * jax.random.normal(kB, (out_features, r), dtype=jnp.float32)

    # Hoisted once (in a real model these are stored pre-transposed / pre-scaled).
    wt, b_f32, at, bts = prepare_lora_params(weight, bias, lora_A, lora_B,
                                             lora_alpha=lora_alpha, r=r)

    # Pure-JAX reference.
    scaling = lora_alpha / r
    x_flat = x.reshape(-1, in_features)
    ref = (x_flat @ weight.T + bias
           + (x_flat @ lora_A.T @ lora_B.T) * scaling).reshape(batch, seq, out_features)

    # f32 compute path: tight numerics at these tiny shapes.
    out_f32 = lora_linear_forward(x, wt, b_f32, at, bts, compute_dtype=jnp.float32)
    out_f32 = jax.block_until_ready(out_f32)
    assert out_f32.shape == (batch, seq, out_features)
    assert jnp.allclose(out_f32, ref, atol=1e-4, rtol=1e-4), "f32 mismatch vs reference"

    # Default bf16 compute path (what you would run at real shapes) -- loose tolerance.
    out_bf16 = jax.block_until_ready(lora_linear_forward(x, wt, b_f32, at, bts))
    assert out_bf16.shape == (batch, seq, out_features)
    assert jnp.allclose(out_bf16, ref, atol=5e-2, rtol=5e-2), "bf16 mismatch vs reference"

    print("KERNEL_OK")
</pallas_src>

<mosaic_0001>
module attributes {stable_mosaic.version = 11 : i64} {
  func.func @_lora_linear_kernel(%arg0: i32, %arg1: i32, %arg2: i32, %arg3: memref<16x32xf32, #tpu.memory_space<vmem>>, %arg4: memref<32x128xf32, #tpu.memory_space<vmem>>, %arg5: memref<16x4xf32, #tpu.memory_space<vmem>>, %arg6: memref<4x128xf32, #tpu.memory_space<vmem>>, %arg7: memref<1x128xf32, #tpu.memory_space<vmem>>, %arg8: memref<16x128xf32, #tpu.memory_space<vmem>>, %arg9: memref<16x128xf32, #tpu.memory_space<vmem>>) attributes {dimension_semantics = [#tpu.dimension_semantics<parallel>, #tpu.dimension_semantics<arbitrary>, #tpu.dimension_semantics<arbitrary>], iteration_bounds = array<i64: 1, 1, 1>, scalar_prefetch = 0 : i64, scratch_operands = 1 : i64, tpu.core_type = #tpu.core_type<tc>, window_params = [{transform_indices = @transform_0, window_bounds = array<i64: 16, 32>}, {transform_indices = @transform_1, window_bounds = array<i64: 32, 128>}, {transform_indices = @transform_2, window_bounds = array<i64: 16, 4>}, {transform_indices = @transform_3, window_bounds = array<i64: 4, 128>}, {transform_indices = @transform_4, window_bounds = array<i64: 1, 128>}, {transform_indices = @transform_5, window_bounds = array<i64: 16, 128>}]} {
    %c0_i32 = arith.constant 0 : i32
    %0 = arith.cmpi eq, %arg2, %c0_i32 : i32
    %1 = arith.extui %0 : i1 to i32
    %c0_i32_0 = arith.constant 0 : i32
    %2 = arith.cmpi ne, %1, %c0_i32_0 : i32
    scf.if %2 {
      %c0_10 = arith.constant 0 : index
      %c0_11 = arith.constant 0 : index
      %12 = vector.load %arg5[%c0_10, %c0_11] : memref<16x4xf32, #tpu.memory_space<vmem>>, vector<16x4xf32>
      %c0_12 = arith.constant 0 : index
      %c0_13 = arith.constant 0 : index
      %13 = vector.load %arg6[%c0_12, %c0_13] : memref<4x128xf32, #tpu.memory_space<vmem>>, vector<4x128xf32>
      %cst_14 = arith.constant dense<0.000000e+00> : vector<16x128xf32>
      %14 = tpu.matmul %12, %13, %cst_14 {dimension_numbers = #tpu.dot_dimension_numbers<[1], [0], [0], [1], [0, 0, 1, 1], [], []>} : vector<16x4xf32>, vector<4x128xf32>, vector<16x128xf32> -> vector<16x128xf32>
      %c0_15 = arith.constant 0 : index
      %c0_16 = arith.constant 0 : index
      %15 = vector.load %arg9[%c0_15, %c0_16] : memref<16x128xf32, #tpu.memory_space<vmem>>, vector<16x128xf32>
      tpu.vector_store %arg9[%c0_15, %c0_16], %14 {strides = array<i32>} : memref<16x128xf32, #tpu.memory_space<vmem>>, vector<16x128xf32>,
    } else {
    }
    %c0 = arith.constant 0 : index
    %c0_1 = arith.constant 0 : index
    %3 = vector.load %arg9[%c0, %c0_1] : memref<16x128xf32, #tpu.memory_space<vmem>>, vector<16x128xf32>
    %c0_2 = arith.constant 0 : index
    %c0_3 = arith.constant 0 : index
    %4 = vector.load %arg3[%c0_2, %c0_3] : memref<16x32xf32, #tpu.memory_space<vmem>>, vector<16x32xf32>
    %c0_4 = arith.constant 0 : index
    %c0_5 = arith.constant 0 : index
    %5 = vector.load %arg4[%c0_4, %c0_5] : memref<32x128xf32, #tpu.memory_space<vmem>>, vector<32x128xf32>
    %cst = arith.constant dense<0.000000e+00> : vector<16x128xf32>
    %6 = tpu.matmul %4, %5, %cst {dimension_numbers = #tpu.dot_dimension_numbers<[1], [0], [0], [1], [0, 0, 1, 1], [], []>} : vector<16x32xf32>, vector<32x128xf32>, vector<16x128xf32> -> vector<16x128xf32>
    %7 = arith.addf %3, %6 : vector<16x128xf32>
    %c0_6 = arith.constant 0 : index
    %c0_7 = arith.constant 0 : index
    %8 = vector.load %arg9[%c0_6, %c0_7] : memref<16x128xf32, #tpu.memory_space<vmem>>, vector<16x128xf32>
    tpu.vector_store %arg9[%c0_6, %c0_7], %7 {strides = array<i32>} : memref<16x128xf32, #tpu.memory_space<vmem>>, vector<16x128xf32>,
    %c0_i32_8 = arith.constant 0 : i32
    %9 = arith.cmpi eq, %arg2, %c0_i32_8 : i32
    %10 = arith.extui %9 : i1 to i32
    %c0_i32_9 = arith.constant 0 : i32
    %11 = arith.cmpi ne, %10, %c0_i32_9 : i32
    scf.if %11 {
      %c0_10 = arith.constant 0 : index
      %c0_11 = arith.constant 0 : index
      %12 = vector.load %arg9[%c0_10, %c0_11] : memref<16x128xf32, #tpu.memory_space<vmem>>, vector<16x128xf32>
      %c0_12 = arith.constant 0 : index
      %c0_13 = arith.constant 0 : index
      %13 = vector.load %arg7[%c0_12, %c0_13] : memref<1x128xf32, #tpu.memory_space<vmem>>, vector<1x128xf32>
      %14 = vector.broadcast %13 : vector<1x128xf32> to vector<16x128xf32>
      %15 = arith.addf %12, %14 : vector<16x128xf32>
      %c0_14 = arith.constant 0 : index
      %c0_15 = arith.constant 0 : index
      %16 = vector.load %arg8[%c0_14, %c0_15] : memref<16x128xf32, #tpu.memory_space<vmem>>, vector<16x128xf32>
      tpu.vector_store %arg8[%c0_14, %c0_15], %15 {strides = array<i32>} : memref<16x128xf32, #tpu.memory_space<vmem>>, vector<16x128xf32>,
    } else {
    }
    return
  }
  func.func @transform_0(%arg0: i32, %arg1: i32, %arg2: i32) -> (i32, i32) {
    %c0_i32 = arith.constant 0 : i32
    return %arg1, %arg2 : i32, i32
  }
  func.func @transform_1(%arg0: i32, %arg1: i32, %arg2: i32) -> (i32, i32) {
    %c0_i32 = arith.constant 0 : i32
    return %arg2, %arg0 : i32, i32
  }
  func.func @transform_2(%arg0: i32, %arg1: i32, %arg2: i32) -> (i32, i32) {
    %c0_i32 = arith.constant 0 : i32
    %c0_i32_0 = arith.constant 0 : i32
    return %arg1, %c0_i32 : i32, i32
  }
  func.func @transform_3(%arg0: i32, %arg1: i32, %arg2: i32) -> (i32, i32) {
    %c0_i32 = arith.constant 0 : i32
    %c0_i32_0 = arith.constant 0 : i32
    return %c0_i32, %arg0 : i32, i32
  }
  func.func @transform_4(%arg0: i32, %arg1: i32, %arg2: i32) -> (i32, i32) {
    %c0_i32 = arith.constant 0 : i32
    %c0_i32_0 = arith.constant 0 : i32
    return %c0_i32, %arg0 : i32, i32
  }
  func.func @transform_5(%arg0: i32, %arg1: i32, %arg2: i32) -> (i32, i32) {
    %c0_i32 = arith.constant 0 : i32
    return %arg1, %arg0 : i32, i32
  }
}

</mosaic_0001>

<bundles_post_ra>
// kernel: tpu_custom_call.1
= control target key start
LH: loop header
LB: loop body
LE: loop exit
PB: predicated region body
PF: predicated region fallthrough
CT: control target
= control target key end

     0   :  { %10 = vsyncpa [#allocation4], 0  ;;  %s436_s0 = inlined_call_operand.vmem [shape: f32[16,32], index: 0, kind: input, shape index: {}]   ;;  %s437_s1 = inlined_call_operand.hbm [shape: f32[32,128], index: 1, kind: input, shape index: {}]   ;;  %s438_s2 = inlined_call_operand.vmem [shape: f32[16,4], index: 2, kind: input, shape index: {}]   ;;  %s439_s3 = inlined_call_operand.vmem [shape: f32[4,128], index: 3, kind: input, shape index: {}]   ;;  %s440_s4 = inlined_call_operand.vmem [shape: f32[1,128], index: 4, kind: input, shape index: {}]   ;;  %s441_s5 = inlined_call_operand.hbm [shape: f32[16,128], index: 5, kind: output, shape index: {}]  }
   0x1   :  { %11 = vsyncpa [#allocation5], 0  ;;  %s350_s18 = smov [#allocation3]   ;;  %s302_s22 = scalar_lea.hbm %s437_s1, 512 }
   0x2   :  { %s19_s19 = sshll.u32 %s350_s18, 4  ;;  %p303_p0 = scmp.ne.s32.totalorder %s437_s1, %s302_s22  ;;  %s20_s19 = int_to_ptr.vmem [resolvable:$true] %s19_s19 }
   0x3   :  { %p306_p1 = scmp.lt.u32.totalorder %s302_s22, %s437_s1 }
   0x5   :  { %p308_p2 = pnand %p306_p1, %p303_p0 }
   0x7   :  { %311 = shalt.err (!%p308_p2)
}
   0x8   :  { %s312_s27 = scalar_lea.vmem %s20_s19, 512  ;;  %p317_p4 = scmp.lt.s32.totalorder %s20_s19, %s20_s19 }
   0x9   :  { %p313_p3 = scmp.ne.s32.totalorder %s20_s19, %s312_s27  ;;  %p318_p5 = scmp.lt.s32.totalorder %s312_s27, %s312_s27 }
   0xb   :  { %p319_p6 = por %p318_p5, %p317_p4 }
   0xd   :  { %p320_p7 = pnand %p319_p6, %p313_p3 }
   0xf   :  { %323 = shalt.err (!%p320_p7)
}
  0x10   :  { %s351_s28 = smov 128   ;;  %s352_s29 = smov 8  }
  0x11   :  { %25 = dma.hbm_to_vmem [thread:$0]  %s437_s1, 512, %s20_s19, [#allocation4], %s351_s28, %s351_s28, %s352_s29  }
  0x12   :  { %346 = dma.done.wait [#allocation4], 512  }
  0x13   :  { %347 = vsyncadd [#allocation4], 4294966784  ;;  %vm49_vm0 = vcmask 1043456   ;;  %vm42_vm1 = vcmask 31744   ;;  %v134_v0 = vld [vmem:[#allocation3] sm:$0xff]  ;;  %v135_v1 = vld [vmem:[#allocation3 + $0x8] sm:$0xff] }
  0x14   :  { %v136_v2 = vld [vmem:[#allocation3 + $0x10] sm:$0xff]  ;;  %v288_v3 = vpack.c.bf16 %v135_v1, %v134_v0  ;;  %v137_v4 = vld [vmem:[#allocation3 + $0x18] sm:$0xff]  ;;  %v41_v5 = vld [vmem:[%s439_s3] sm:$0xf]  ;;  %vm138_vm2 = vcmask 261120   ;;  %s353_s16 = smov [#allocation6]  }
  0x15   :  { %v39_v6 = vld [vmem:[%s438_s2] sm:$0xff]  ;;  %v292_v7 = vpack.c.bf16 %v137_v4, %v136_v2  ;;  %272 = vmatprep.subr.msk.mxu1 %vm49_vm0, %v41_v5  ;;  %v40_v8 = vld [vmem:[%s438_s2 + $0x8] sm:$0xff]  ;;  %s245_s17 = sshll.u32 %s353_s16, 4  ;;  %s246_s17 = int_to_ptr.vmem [resolvable:$true] %s245_s17 }
  0x16   :  { %274 = vmatprep.mubr.msk.f32.mxu1 %vm42_vm1, %v39_v6  ;;  %v132_v9 = vld [vmem:[%s436_s0] sm:$0xff]  ;;  %289 = vmatprep.subr.bf16.mxu0 %v288_v3  ;;  %v133_v10 = vld [vmem:[%s436_s0 + $0x8] sm:$0xff]  ;;  %s324_s18 = scalar_lea.vmem %s246_s17, 256  ;;  %p329_p9 = scmp.lt.s32.totalorder %s246_s17, %s246_s17 }
  0x17   :  { %273 = vmatpush3.msk.msra.mxu1 %vm49_vm0, %v41_v5  ;;  %291 = vmatpush3.bf16.msra.mxu0 %v288_v3  ;;  %v262_v14 = vld [vmem:[%s440_s4] ss:$0 sm:$0xff]  ;;  %p325_p8 = scmp.ne.s32.totalorder %s246_s17, %s324_s18  ;;  %p330_p10 = scmp.lt.s32.totalorder %s324_s18, %s324_s18 }
  0x18   :  { %275 = vmatmul.mubr.msk.f32.vlgmr.msra.gmra.mrb[0].mxu1 %vm42_vm1, %v40_v8  ;;  %293 = vmatprep.subr.bf16.mxu0 %v292_v7 }
  0x19   :  { %285 = vmatprep.mubr.msk.f32.mxu0 %vm138_vm2, %v132_v9  ;;  %p331_p11 = por %p330_p10, %p329_p9 }
  0x1b   :  { %295 = vmatpush3.bf16.msra.mxu0 %v292_v7  ;;  %p332_p12 = pnand %p331_p11, %p325_p8 }
  0x1e   :  { %286 = vmatmul.mubr.msk.f32.vlgmr.msra.gmra.mrb[0].mxu0 %vm138_vm2, %v133_v10 }
  0xeb   :  { %v276_v11 = vpop.f32.mrb[0].mxu1 }
  0xec   :  { %v119_v12 = vpop.f32.mrb[1].mxu1 }
  0xf1   :  { %v287_v13 = vpop.f32.mrb[0].mxu0 }
  0xf2   :  { %v221_v15 = vadd.f32 %v287_v13, %v276_v11  ;;  %v211_v16 = vpop.f32.mrb[1].mxu0 }
  0xf3   :  { %v220_v17 = vadd.f32 %v211_v16, %v119_v12 }
  0xf4   :  { %v237_v18 = vadd.f32 %v262_v14, %v221_v15 }
  0xf5   :  { %v236_v19 = vadd.f32 %v262_v14, %v220_v17 }
  0xf6   :  { %239 = vst [vmem:[#allocation6 + $0x8] sm:$0xff] %v237_v18 }
  0xf7   :  { %238 = vst [vmem:[#allocation6] sm:$0xff] %v236_v19 }
  0xf8   :  { %335 = shalt.err (!%p332_p12)
}
  0xf9   :  { %s336_s4 = scalar_lea.hbm %s441_s5, 256 }
  0xfa   :  { %p337_p13 = scmp.ne.s32.totalorder %s441_s5, %s336_s4  ;;  %p340_p0 = scmp.lt.u32.totalorder %s336_s4, %s441_s5 }
  0xfc   :  { %p342_p1 = pnand %p340_p0, %p337_p13 }
  0xfe   :  { %345 = shalt.err (!%p342_p1)
}
  0xff   :  { %251 = dma.vmem_to_hbm [thread:$0]  %s246_s17, 256, %s441_s5, [#allocation5], %s351_s28, %s351_s28, %s352_s29  }
 0x100   :  { %348 = dma.done.wait [#allocation5], 256  }
 0x101   :  { %349 = vsyncadd [#allocation5], 4294967040 }
 0x102   :  { %255 = vsyncpa [#allocation4], 1 }
 0x103   :  { %256 = vsyncpa [#allocation5], 1 }

</bundles_post_ra>
